<compile_context>
chip_gen: v6e
topology: v6e:2x2x1
jax: 0.10.0
libtpu: 0.0.40
codegen_flags: <defaults>
</compile_context>

<pallas_src>
import jax
import jax.numpy as jnp
from jax.experimental import pallas as pl
from jax.experimental.pallas import tpu as pltpu

_LANE = 128
_MIB = 1024 * 1024


def _chip_budget():
    """Return (target_tile_bytes, max_lane_tile, vmem_limit_bytes) per TPU gen."""
    kind = ""
    try:
        kind = jax.devices()[0].device_kind.lower()
    except Exception:  # pragma: no cover - defensive
        pass
    if "v2" in kind or "v3" in kind or "v4" in kind:
        # Older chips / small scoped VMEM: stay conservative.
        return 2 * _MIB, 4096, 24 * _MIB
    if "v5" in kind:
        # v5e: ~0.82 TB/s HBM -> 4 MiB tiles already amortize the 0.35 us step
        # overhead to ~3%; 128 MiB physical VMEM, raise 16 MiB scoped default.
        return 4 * _MIB, 8192, 32 * _MIB
    if "v6" in kind:
        # v6e: 128 MiB VMEM, ~1.4 TB/s HBM -> 8 MiB tiles, 64 MiB limit
        # (2x(in+out) = 32 MiB of buffers, ample headroom for the compiler).
        return 8 * _MIB, 8192, 64 * _MIB
    # v7x (or unknown): only 64 MiB VMEM/TC but ~3.2 TB/s HBM.  ~6 MiB tiles
    # keep step overhead <10% and the double-buffered working set (~24 MiB)
    # far under the 48 MiB safe ceiling.
    return 6 * _MIB, 8192, 48 * _MIB


def _sublane(itemsize):
    # Sublane granularity by dtype packing: f32 -> 8, bf16/f16 -> 16, int8 -> 32.
    return max(8, 32 // itemsize)


def _affine_kernel(x_ref, scale_ref, shift_ref, o_ref):
    # Shared elementwise body.  Works for both layouts:
    #  main path : x_ref (1, trc, tc),   scale/shift (trc, 1)  -> broadcast lanes
    #  small path: x_ref (trn, tcols),   scale/shift (1, tcols) -> broadcast rows
    x = x_ref[...].astype(jnp.float32)
    o_ref[...] = (x * scale_ref[...] + shift_ref[...]).astype(o_ref.dtype)


def _fbn_channels_on_sublanes(x3, scale, shift, target_bytes, max_lane, vmem_limit):
    """Main path: x3 = (N, C, HW), HW >= 128 (lane-dense)."""
    N, C, HW = x3.shape
    itemsize = x3.dtype.itemsize
    sub = _sublane(itemsize)

    # Lane axis: full HW when it fits, otherwise a 128-multiple cap.
    tc = HW if HW <= max_lane else max_lane
    # Sublane (channel) axis: fill up to the per-chip target tile size.
    trc = (target_bytes // (tc * itemsize)) // sub * sub
    if trc <= 0:
        trc = sub
    if trc >= C:
        trc = C  # full channel extent is always a legal block extent

    grid = (pl.cdiv(C, trc), N, pl.cdiv(HW, tc))

    return pl.pallas_call(
        _affine_kernel,
        out_shape=jax.ShapeDtypeStruct((N, C, HW), x3.dtype),
        grid_spec=pltpu.PrefetchScalarGridSpec(
            num_scalar_prefetch=0,
            grid=grid,
            in_specs=[
                pl.BlockSpec((1, trc, tc), lambda i, n, j: (n, i, j)),
                pl.BlockSpec((trc, 1), lambda i, n, j: (i, 0)),
                pl.BlockSpec((trc, 1), lambda i, n, j: (i, 0)),
            ],
            out_specs=pl.BlockSpec((1, trc, tc), lambda i, n, j: (n, i, j)),
        ),
        compiler_params=pltpu.CompilerParams(
            dimension_semantics=("parallel", "parallel", "parallel"),
            vmem_limit_bytes=vmem_limit,
        ),
    )(x3, scale.reshape(C, 1), shift.reshape(C, 1))


def _fbn_channels_on_lanes(x2, scale_row, shift_row, target_bytes, max_lane,
                           vmem_limit):
    """Small-HW path: x2 = (N, C*HW), params pre-broadcast to (1, C*HW)."""
    N, CHW = x2.shape
    itemsize = x2.dtype.itemsize
    sub = _sublane(itemsize)

    tcols = CHW if CHW <= max_lane else max_lane
    trows = (target_bytes // (tcols * itemsize)) // sub * sub
    if trows <= 0:
        trows = sub
    if trows >= N:
        trows = N  # full batch extent is always legal

    # Column blocks outermost so the lane-dense param row stays resident
    # across the batch sweep.
    grid = (pl.cdiv(CHW, tcols), pl.cdiv(N, trows))

    return pl.pallas_call(
        _affine_kernel,
        out_shape=jax.ShapeDtypeStruct((N, CHW), x2.dtype),
        grid_spec=pltpu.PrefetchScalarGridSpec(
            num_scalar_prefetch=0,
            grid=grid,
            in_specs=[
                pl.BlockSpec((trows, tcols), lambda j, n: (n, j)),
                pl.BlockSpec((1, tcols), lambda j, n: (0, j)),
                pl.BlockSpec((1, tcols), lambda j, n: (0, j)),
            ],
            out_specs=pl.BlockSpec((trows, tcols), lambda j, n: (n, j)),
        ),
        compiler_params=pltpu.CompilerParams(
            dimension_semantics=("parallel", "parallel"),
            vmem_limit_bytes=vmem_limit,
        ),
    )(x2, scale_row, shift_row)


def frozen_batch_norm_2d(x, weight, bias, running_mean, running_var):
    """x: (N, C, H, W). Returns x * scale + shift (per channel), same dtype."""
    N, C, H, W = x.shape
    HW = H * W

    # Fold the frozen statistics into a per-channel affine (f32 so narrow
    # inputs don't lose parameter precision).  NOTE: no eps, matching the
    # reference module's forward exactly.
    scale = weight.astype(jnp.float32) * jax.lax.rsqrt(
        running_var.astype(jnp.float32))
    shift = bias.astype(jnp.float32) - running_mean.astype(jnp.float32) * scale

    target_bytes, max_lane, vmem_limit = _chip_budget()

    if HW >= _LANE:
        # Lane axis = H*W (lane-dense), channels on sublanes.
        x3 = x.reshape(N, C, HW)  # free reshape, no transpose traffic
        out3 = _fbn_channels_on_sublanes(
            x3, scale, shift, target_bytes, max_lane, vmem_limit)
        return out3.reshape(N, C, H, W)

    # Small feature maps (HW < 128): a HW lane axis would make every store a
    # masked vst with most lanes dead.  Fold channels onto the lane axis and
    # pre-broadcast the folded params into one lane-dense row (C*HW f32 elems,
    # negligible vs N*C*HW of x traffic).
    x2 = x.reshape(N, C * HW)
    scale_row = jnp.broadcast_to(scale[:, None], (C, HW)).reshape(1, C * HW)
    shift_row = jnp.broadcast_to(shift[:, None], (C, HW)).reshape(1, C * HW)
    out2 = _fbn_channels_on_lanes(
        x2, scale_row, shift_row, target_bytes, max_lane, vmem_limit)
    return out2.reshape(N, C, H, W)


if __name__ == "__main__":
    key = jax.random.PRNGKey(0)
    k_x, k_w, k_b, k_m, k_v = jax.random.split(key, 5)

    N, C, H, W = 2, 4, 16, 16
    x = jax.random.normal(k_x, (N, C, H, W), dtype=jnp.float32)

    # Deterministic, non-trivial "frozen" buffers (shapes from __init__: (C,)).
    weight = 1.0 + 0.1 * jax.random.normal(k_w, (C,), dtype=jnp.float32)
    bias = 0.1 * jax.random.normal(k_b, (C,), dtype=jnp.float32)
    running_mean = 0.1 * jax.random.normal(k_m, (C,), dtype=jnp.float32)
    running_var = jnp.abs(1.0 + 0.1 * jax.random.normal(k_v, (C,),
                                                        dtype=jnp.float32))

    # Reference (pure JAX, mirrors the PyTorch forward exactly — no eps).
    ref_scale = (weight * jax.lax.rsqrt(running_var)).reshape(1, C, 1, 1)
    ref_shift = (bias - running_mean *
                 (weight * jax.lax.rsqrt(running_var))).reshape(1, C, 1, 1)

    # 1) Main path: HW >= 128, f32 in / f32 out.
    out = jax.block_until_ready(
        frozen_batch_norm_2d(x, weight, bias, running_mean, running_var))
    ref = x * ref_scale + ref_shift
    assert out.shape == (N, C, H, W)
    assert out.dtype == x.dtype
    assert jnp.allclose(out, ref, atol=1e-6, rtol=1e-6)

    # 2) Narrow-storage path: bf16 in / bf16 out, f32 compute inside the kernel.
    xb = x.astype(jnp.bfloat16)
    outb = jax.block_until_ready(
        frozen_batch_norm_2d(xb, weight, bias, running_mean, running_var))
    refb = (xb.astype(jnp.float32) * ref_scale + ref_shift).astype(jnp.bfloat16)
    assert outb.dtype == jnp.bfloat16
    assert jnp.allclose(outb.astype(jnp.float32), refb.astype(jnp.float32),
                        atol=2e-2, rtol=2e-2)

    # 3) Small-feature-map path: HW < 128 -> channels folded onto the lane axis.
    Hs = Ws = 7
    xs = jax.random.normal(k_x, (N, C, Hs, Ws), dtype=jnp.float32)
    outs = jax.block_until_ready(
        frozen_batch_norm_2d(xs, weight, bias, running_mean, running_var))
    refs = xs * ref_scale + ref_shift
    assert outs.shape == (N, C, Hs, Ws)
    assert jnp.allclose(outs, refs, atol=1e-6, rtol=1e-6)

    print("KERNEL_OK")
</pallas_src>

<mosaic_0001>
module attributes {stable_mosaic.version = 11 : i64} {
  func.func @_affine_kernel(%arg0: i32, %arg1: i32, %arg2: i32, %arg3: memref<1x4x256xf32, #tpu.memory_space<vmem>>, %arg4: memref<4x1xf32, #tpu.memory_space<vmem>>, %arg5: memref<4x1xf32, #tpu.memory_space<vmem>>, %arg6: memref<1x4x256xf32, #tpu.memory_space<vmem>>) attributes {dimension_semantics = [#tpu.dimension_semantics<parallel>, #tpu.dimension_semantics<parallel>, #tpu.dimension_semantics<parallel>], iteration_bounds = array<i64: 1, 2, 1>, scalar_prefetch = 0 : i64, scratch_operands = 0 : i64, tpu.core_type = #tpu.core_type<tc>, window_params = [{transform_indices = @transform_0, window_bounds = array<i64: 1, 4, 256>}, {transform_indices = @transform_1, window_bounds = array<i64: 4, 1>}, {transform_indices = @transform_2, window_bounds = array<i64: 4, 1>}, {transform_indices = @transform_3, window_bounds = array<i64: 1, 4, 256>}]} {
    %c0 = arith.constant 0 : index
    %c0_0 = arith.constant 0 : index
    %c0_1 = arith.constant 0 : index
    %0 = vector.load %arg3[%c0, %c0_0, %c0_1] : memref<1x4x256xf32, #tpu.memory_space<vmem>>, vector<1x4x256xf32>
    %c0_2 = arith.constant 0 : index
    %c0_3 = arith.constant 0 : index
    %1 = vector.load %arg4[%c0_2, %c0_3] : memref<4x1xf32, #tpu.memory_space<vmem>>, vector<4x1xf32>
    %2 = vector.shape_cast %1 : vector<4x1xf32> to vector<1x4x1xf32>
    %3 = vector.broadcast %2 : vector<1x4x1xf32> to vector<1x4x256xf32>
    %4 = arith.mulf %0, %3 : vector<1x4x256xf32>
    %c0_4 = arith.constant 0 : index
    %c0_5 = arith.constant 0 : index
    %5 = vector.load %arg5[%c0_4, %c0_5] : memref<4x1xf32, #tpu.memory_space<vmem>>, vector<4x1xf32>
    %6 = vector.shape_cast %5 : vector<4x1xf32> to vector<1x4x1xf32>
    %7 = vector.broadcast %6 : vector<1x4x1xf32> to vector<1x4x256xf32>
    %8 = arith.addf %4, %7 : vector<1x4x256xf32>
    %c0_6 = arith.constant 0 : index
    %c0_7 = arith.constant 0 : index
    %c0_8 = arith.constant 0 : index
    %9 = vector.load %arg6[%c0_6, %c0_7, %c0_8] : memref<1x4x256xf32, #tpu.memory_space<vmem>>, vector<1x4x256xf32>
    tpu.vector_store %arg6[%c0_6, %c0_7, %c0_8], %8 {strides = array<i32>} : memref<1x4x256xf32, #tpu.memory_space<vmem>>, vector<1x4x256xf32>,
    return
  }
  func.func @transform_0(%arg0: i32, %arg1: i32, %arg2: i32) -> (i32, i32, i32) {
    %c0_i32 = arith.constant 0 : i32
    return %arg1, %arg0, %arg2 : i32, i32, i32
  }
  func.func @transform_1(%arg0: i32, %arg1: i32, %arg2: i32) -> (i32, i32) {
    %c0_i32 = arith.constant 0 : i32
    %c0_i32_0 = arith.constant 0 : i32
    return %arg0, %c0_i32 : i32, i32
  }
  func.func @transform_2(%arg0: i32, %arg1: i32, %arg2: i32) -> (i32, i32) {
    %c0_i32 = arith.constant 0 : i32
    %c0_i32_0 = arith.constant 0 : i32
    return %arg0, %c0_i32 : i32, i32
  }
  func.func @transform_3(%arg0: i32, %arg1: i32, %arg2: i32) -> (i32, i32, i32) {
    %c0_i32 = arith.constant 0 : i32
    return %arg1, %arg0, %arg2 : i32, i32, i32
  }
}

</mosaic_0001>

<bundles_post_ra>
// kernel: tpu_custom_call.1
= control target key start
LH: loop header
LB: loop body
LE: loop exit
PB: predicated region body
PF: predicated region fallthrough
CT: control target
= control target key end

     0   :  { %8 = vsyncpa [#allocation3], 0  ;;  %s782_s0 = inlined_call_operand.hbm [shape: f32[2,4,256], index: 0, kind: input, shape index: {}]   ;;  %s783_s1 = inlined_call_operand.vmem [shape: f32[4,1], index: 1, kind: input, shape index: {}]   ;;  %s784_s2 = inlined_call_operand.vmem [shape: f32[4,1], index: 2, kind: input, shape index: {}]   ;;  %s785_s3 = inlined_call_operand.hbm [shape: f32[2,4,256], index: 3, kind: output, shape index: {}]  }
   0x1   :  { %10 = vsyncpa [#allocation3 + $0x1], 0 }
   0x2   :  { %11 = vsyncpa [#allocation4], 0 }
   0x3   :  { %13 = vsyncpa [#allocation4 + $0x1], 0  ;;  %s642_s12 = smov 0   ;;  %s644_s13 = smov 0  }
   0x4   :  { %s646_s14 = smov 0   ;;  %s648_s15 = smov 0  }
   0x5   :  { %s650_s16 = smov 0   ;;  %s652_s17 = smov 0  }
   0x6 LB: > { %s424_s18 = sadd.s32 4294967295, %s616_s17   ;;  %s425_s19 = sadd.s32 4294967294, %s616_s17   ;;  %s616_s17 = sphi %s652_s17, %s19_s17   ;;  %s612_s16 = sphi %s650_s16, %s797_s16   ;;  %s608_s15 = sphi %s648_s15, %s796_s15   ;;  %s604_s14 = sphi %s646_s14, %s795_s14   ;;  %s600_s13 = sphi %s644_s13, %s794_s13   ;;  %s596_s12 = sphi %s642_s12, %s793_s12  }
   0x7   : > { %s34_s20 = sadd.s32 1, %s612_s16  ;;  %s49_s21 = sadd.s32 1, %s604_s14 }
   0x8   : > { %p36_p0 = scmp.ge.s32.totalorder %s34_s20, 2  ;;  %p56_p1 = scmp.ne.s32.totalorder %s604_s14, %s600_s13 }
   0x9   : > { %p57_p2 = scmp.eq.s32.totalorder %s616_s17, 0  ;;  %p62_p3 = scmp.ne.s32.totalorder %s600_s13, %s596_s12 }
   0xa   : > { %s799_s20 = smov (%p36_p0, %s34_s20), 0  ;;  %p63_p5 = scmp.eq.s32.totalorder %s424_s18, 0 }
   0xb   : > { %p683_p4 = por %p57_p2, %p56_p1  ;;  %s42_s23 = ssub.s32 %s612_s16, %s799_s20 }
   0xc   : > { %p142_p6 = scmp.eq.s32.totalorder %s424_s18, 1  ;;  %p47_p7 = scmp.eq.s32.totalorder %s42_s23, 0 }
   0xd   : > { %p689_p8 = por %p63_p5, %p62_p3  ;;  %p148_p10 = scmp.eq.s32.totalorder %s425_s19, 1 }
   0xe   : > { %p693_p9 = por %p142_p6, %p56_p1  ;;  %p455_p13 = scmp.lt.s32.totalorder %s616_s17, 2 }
   0xf   : > { %s698_s26 = scalar_select %p47_p7, %s604_s14, %s49_s21  }
  0x10   : > { %p700_p11 = por %p148_p10, %p62_p3  ;;  %s182_s28 = sand.u32 1, %s604_s14  }
  0x11   : > { %s430_s29 = sshll.u32 %s182_s28, 3  ;;  %s441_s30 = sshll.u32 %s612_s16, 7 }
  0x12   : > { %s789_s27 = scalar_select %p700_p11, 1, 0 }
  0x13   : > { %s196_s6 = scalar_lea.hbm %s782_s0, %s441_s30  ;;  %s186_s7 = scalar_lea.vmem [#allocation2], %s430_s29 }
  0x14   : > { %s198_s8 = sshll.u32 %s186_s7, 4  ;;  %p713_p0 = pnand %p455_p13, %p683_p4  ;;  %s199_s8 = int_to_ptr.vmem [resolvable:$true] %s198_s8 }
  0x15   : > { %p433_p1 = scmp.ge.s32.totalorder %s616_s17, 1  ;;  %p203_p2 = scmp.lt.s32.totalorder %s616_s17, 3 }
  0x16   : > { %s183_s10 = scalar_lea.sflag [#allocation3], %s182_s28  ;;  %p510_p3 = pneg %p713_p0 }
  0x17   : > { %s521_s11 = scalar_lea.vmem %s199_s8, 128  ;;  %s618_s18 = smov [#allocation2]  }
  0x18   : > { %p522_p5 = scmp.ne.s32.totalorder %s199_s8, %s521_s11  ;;  %s526_s19 = sshll.u32 %s618_s18, 4  ;;  %s527_s19 = int_to_ptr.vmem [resolvable:$false] %s526_s19 }
  0x19   : > { %s528_s21 = scalar_lea.vmem %s527_s19, 256  ;;  %p529_p10 = scmp.lt.s32.totalorder %s199_s8, %s527_s19 }
  0x1a   : > { %p524_p6 = pnand %p522_p5, %p510_p3  ;;  %p530_p12 = scmp.lt.s32.totalorder %s528_s21, %s521_s11 }
  0x1c   : > { %p525_p7 = pneg %p524_p6  ;;  %p531_p4 = por %p530_p12, %p529_p10 }
  0x1e   : > { %p532_p13 = pnand %p531_p4, %p525_p7 }
  0x20   : > { %535 = shalt.err (!%p532_p13)
}
  0x21   : > { %450 = dma.hbm_to_vmem [thread:$0]  (!%p713_p0), %s196_s6, 128, %s199_s8, %s183_s10  }
  0x22   : > { %p204_p11 = pnand %p433_p1, %p203_p2 }
  0x23   : > { %s728_s22 = sand.u32 (!%p204_p11), 1, %s600_s13  }
  0x24   : > { %207 = sbr.rel (%p204_p11) target bundleno = 189 (0xbd), region = 32  ;;  %s434_s23 = sshll.u32 (!%p204_p11), %s728_s22, 3 }
  0x25   : > { %s210_s28 = scalar_lea.sflag (!%p204_p11), [#allocation3], %s728_s22  ;;  %s213_s29 = scalar_lea.vmem (!%p204_p11), [#allocation2], %s434_s23 }
  0x29   : > { %587 = dma.done.wait (%p689_p8), %s210_s28, 128  }
  0x2a   : > { %589 = vsyncadd (%p689_p8), %s210_s28, 4294967168  ;;  %v619_v0 = vmov 0   ;;  %v255_v1 = vld [vmem:[%s783_s1] sm:$0xf]  ;;  %v620_v3 = vmov 839922192   ;;  %v263_v5 = vlaneseq }
  0x2b   : > { %507 = vset.pattern.permute.xlu0 %v619_v0  ;;  %v269_v2 = vld [vmem:[%s784_s2] sm:$0xf]  ;;  %v261_v4 = vunpack.c.l.s4 %v620_v3  ;;  %s442_s24 = sshll.u32 %s608_s15, 7  ;;  %s243_s7 = scalar_lea.vmem [#allocation5], %s434_s23 }
  0x2c   : > { %258 = vperm.xlu0 %507, %v255_v1   ;;  %v264_v7 = vshrl.u32 %v263_v5, 7  ;;  %v254_v11 = vld [vmem:[%s213_s29] sm:$0xff]  ;;  %s303_s8 = sshll.u32 %s243_s7, 4  ;;  %s301_s11 = scalar_lea.hbm %s785_s3, %s442_s24  ;;  %s304_s8 = int_to_ptr.vmem [resolvable:$true] %s303_s8 }
  0x2d   : > { %v262_v6 = vunpack.c.0.s8 %v261_v4  ;;  %s285_s18 = scalar_lea.sflag [#allocation4], %s728_s22  ;;  %s536_s19 = scalar_lea.vmem %s304_s8, 128 }
  0x2e   : > { %p537_p8 = scmp.ne.s32.totalorder %s304_s8, %s536_s19  ;;  %s621_s21 = smov [#allocation5]  }
  0x2f   : > { %v265_v8 = vsub.s32 %v262_v6, %v264_v7  ;;  %s540_s28 = sshll.u32 %s621_s21, 4  ;;  %s541_s28 = int_to_ptr.vmem [resolvable:$false] %s540_s28 }
  0x30   : > { %272 = vperm.xlu0 %507, %v269_v2   ;;  %p538_p11 = pnand %p537_p8, %p693_p9  ;;  %s542_s15 = scalar_lea.vmem %s541_s28, 256 }
  0x31   : > { %p543_p0 = scmp.lt.s32.totalorder %s304_s8, %s541_s28  ;;  %p544_p1 = scmp.lt.s32.totalorder %s542_s15, %s536_s19 }
  0x32   : > { %p539_p12 = pneg %p538_p11 }
  0x33   : > { %p545_p2 = por %p544_p1, %p543_p0 }
  0x35   : > { %p546_p3 = pnand %p545_p2, %p539_p12 }
  0xa7   : > { %v259_v9 = vpop.permute.xlu0 %258 }
  0xa8   : > { %v266_v10 = vrot.slane %v259_v9, %v265_v8 }
  0xaa   : > { %v268_v13 = vmul.f32 %v266_v10, %v254_v11 }
  0xab   : > { %v273_v12 = vpop.permute.xlu0 %272 }
  0xac   : > { %v280_v14 = vrot.slane %v273_v12, %v265_v8 }
  0xae   : > { %v282_v15 = vadd.f32 %v280_v14, %v268_v13 }
  0xb0   : > { %283 = vst [vmem:[%s243_s7] sm:$0xff] %v282_v15 }
  0xb1   : > { %549 = shalt.err (!%p546_p3)
}
  0xb2   : > { %s550_s23 = scalar_lea.hbm %s301_s11, 128  ;;  %s554_s30 = scalar_lea.hbm %s785_s3, 256 }
  0xb3   : > { %p551_p5 = scmp.ne.s32.totalorder %s301_s11, %s550_s23  ;;  %p555_p10 = scmp.lt.s32.totalorder %s301_s11, %s785_s3 }
  0xb4   : > { %p556_p4 = scmp.lt.s32.totalorder %s554_s30, %s550_s23 }
  0xb5   : > { %p552_p6 = pnand %p551_p5, %p693_p9 }
  0xb6   : > { %p557_p13 = por %p556_p4, %p555_p10 }
  0xb7   : > { %p553_p7 = pneg %p552_p6 }
  0xb9   : > { %p558_p8 = pnand %p557_p13, %p553_p7 }
  0xbb   : > { %561 = shalt.err (!%p558_p8)
}
  0xbc   : > { %445 = dma.vmem_to_hbm [thread:$0]  (%p693_p9), %s304_s8, 128, %s301_s11, %s285_s18  }
  0xbd PF: > { %s315_s6 = sand.u32 1, %s596_s12   ;;  %p791_p11 = scmp.ne.s32.totalorder %s789_s27, 0 }
  0xbe   : > { %p792_p12 = scmp.ge.s32.totalorder %s616_s17, 2  ;;  %s316_s24 = scalar_lea.sflag [#allocation4], %s315_s6 }
  0xc0   : > { %p452_p0 = pnand %p792_p12, %p791_p11 }
  0xc2   : > { %p453_p1 = pneg %p452_p0 }
  0xc4   : > { %591 = dma.done.wait (%p453_p1), %s316_s24, 128  }
  0xc5   : > { %593 = vsyncadd (%p453_p1), %s316_s24, 4294967168  ;;  %s19_s17 = sadd.s32 1, %s616_s17   ;;  %s793_s12 = smov %s600_s13 }
  0xc6   : > { %p16_p2 = scmp.ge.s32.totalorder %s19_s17, 4   ;;  %s794_s13 = smov %s604_s14 }
  0xc7   : > { %s795_s14 = smov %s698_s26  ;;  %s796_s15 = smov %s612_s16 }
  0xc8   : > { %s797_s16 = smov %s799_s20  ;;  %18 = sbr.rel (!%p16_p2) target bundleno = 6 (0x6), region = 83 }
  0xcd   :  { %321 = vsyncpa [#allocation3], 1 }
  0xce   :  { %323 = vsyncpa [#allocation3 + $0x1], 1 }
  0xcf   :  { %324 = vsyncpa [#allocation4], 1 }
  0xd0   :  { %326 = vsyncpa [#allocation4 + $0x1], 1 }

</bundles_post_ra>
